<compile_context>
chip_gen: v5e
topology: v5e:2x2
jax: 0.10.0
libtpu: 0.0.40
codegen_flags: <defaults>
</compile_context>

<pallas_src>
import functools
import math

import jax
import jax.numpy as jnp
from jax import lax
from jax.experimental import pallas as pl
from jax.experimental.pallas import tpu as pltpu


def _softmax_kernel(x_ref, bmax_ref, bsum_ref, o_ref, *, groups, width, sub_rows):
    """Softmax along each `width`-wide lane group of a (row_tile, groups*width) block.

    bmax_ref: (groups, groups*width) 0/1 matrix, broadcasts per-group maxima to lanes.
    bsum_ref: (groups*width, groups*width) block-diagonal ones, segmented sum + broadcast.
    """
    row_tile = x_ref.shape[0]
    n_sub = row_tile // sub_rows

    def process(row_start):
        rows_sl = pl.ds(row_start, sub_rows)
        x = x_ref[rows_sl, :].astype(jnp.float32)               # full-width load

        if groups == 1:
            # Un-folded fallback path: plain last-axis softmax.
            m = jnp.max(x, axis=-1, keepdims=True)               # aten.amax
            e = jnp.exp(x - m)                                    # aten.sub + aten.exp
            s = jnp.sum(e, axis=-1, keepdims=True)                # aten.sum
            o_ref[rows_sl, :] = (e / s).astype(o_ref.dtype)       # aten.div
            return

        # ---- per-group max: the only group-aware reduction (aten.amax) ----
        iota_g = lax.broadcasted_iota(jnp.int32, (1, groups), 1)
        m_small = jnp.zeros((sub_rows, groups), jnp.float32)
        for j in range(groups):
            mj = jnp.max(
                x_ref[rows_sl, j * width:(j + 1) * width].astype(jnp.float32),
                axis=-1, keepdims=True)                           # (sub_rows, 1)
            # Place group j's max into column j (masked add, exact).
            m_small = m_small + jnp.where(iota_g == j, mj, 0.0)

        # Broadcast group maxima back to all 128 lanes with a tiny 0/1 matmul (MXU).
        m_b = jnp.dot(m_small, bmax_ref[...],
                      precision=lax.Precision.HIGHEST,
                      preferred_element_type=jnp.float32)         # (sub_rows, wf)

        e = jnp.exp(x - m_b)                                      # full-width sub + exp

        # Segmented sum + broadcast in one block-diagonal matmul (MXU, idle otherwise).
        s_b = jnp.dot(e, bsum_ref[...],
                      precision=lax.Precision.HIGHEST,
                      preferred_element_type=jnp.float32)         # (sub_rows, wf)

        # Exact divide (the approx-only vrcp was the previous correctness failure).
        o_ref[rows_sl, :] = (e / s_b).astype(o_ref.dtype)         # one unmasked store

    if n_sub == 1:
        process(0)
    else:
        def body(i, carry):
            process(pl.multiple_of(i * sub_rows, sub_rows))
            return carry

        lax.fori_loop(0, n_sub, body, None, unroll=min(n_sub, 4))


def _pick_row_tile(rows2, wf, itemsize, budget_bytes=2 << 20):
    """Largest multiple-of-8 divisor of rows2 within a ~2 MiB per-block budget.

    Prefers >= 2 grid steps (rows2 >= 16) so v7x can shard the grid over both
    TensorCores; budget is sized from the actual element size.
    """
    budget_rows = max(8, budget_bytes // (wf * itemsize))
    cap = min(budget_rows, rows2 // 2 if rows2 >= 16 else rows2)
    for t in range(min(cap, rows2), 7, -1):
        if rows2 % t == 0 and t % 8 == 0:
            return t
    return None


def softmax_last_dim(x):
    """Numerically-stable softmax over the last axis (matches the aten graph)."""
    orig_shape = x.shape
    W = orig_shape[-1]
    rows = math.prod(orig_shape[:-1]) if len(orig_shape) > 1 else 1
    itemsize = jnp.dtype(x.dtype).itemsize

    # ---- lane-dense fold: pack g consecutive rows into one (g*W)-lane row ----
    g = 1
    if W % 128 != 0:
        cand = 128 // math.gcd(W, 128)          # smallest g with (g*W) % 128 == 0
        if rows % cand == 0:
            g = cand
        # TODO(synk): when rows % cand != 0, pad a few rows in-kernel instead of
        # dropping the fold (g=1 blocks are 8x lane-masked).
    rows2 = rows // g
    wf = g * W

    x2 = x.reshape(rows2, wf)                   # row-major flatten: no HBM copy

    row_tile = _pick_row_tile(rows2, wf, itemsize)
    pad = 0
    if row_tile is None:
        if rows2 * wf * itemsize <= (4 << 20):
            row_tile = rows2                    # single full-extent block
            # TODO(synk): split this rare grid==1 path in two for v7x megacore.
        else:
            # Rare ragged fallback: pad folded rows to a multiple of 8.
            # TODO(synk): handle the ragged tail in-kernel instead of this copy.
            pad = (-rows2) % 8
            x2 = jnp.concatenate([x2, jnp.zeros((pad, wf), x2.dtype)], axis=0)
            rows2 += pad
            row_tile = _pick_row_tile(rows2, wf, itemsize) or 8

    sub_rows = next((c for c in (64, 32, 16, 8) if row_tile % c == 0), row_tile)
    grid = rows2 // row_tile

    # Constant selector matrices (held in VMEM, same block every grid step).
    lane_group = jnp.arange(wf, dtype=jnp.int32) // W
    bmax = (jnp.arange(g, dtype=jnp.int32)[:, None] == lane_group[None, :]).astype(jnp.float32)
    bsum = (lane_group[:, None] == lane_group[None, :]).astype(jnp.float32)

    kernel = functools.partial(_softmax_kernel, groups=g, width=W, sub_rows=sub_rows)
    out2 = pl.pallas_call(
        kernel,
        out_shape=jax.ShapeDtypeStruct((rows2, wf), x.dtype),
        grid_spec=pltpu.PrefetchScalarGridSpec(
            num_scalar_prefetch=0,
            grid=(grid,),
            in_specs=[
                pl.BlockSpec((row_tile, wf), lambda i: (i, 0)),
                pl.BlockSpec((g, wf), lambda i: (0, 0)),
                pl.BlockSpec((wf, wf), lambda i: (0, 0)),
            ],
            out_specs=pl.BlockSpec((row_tile, wf), lambda i: (i, 0)),
        ),
        compiler_params=pltpu.CompilerParams(
            dimension_semantics=("parallel",),
            vmem_limit_bytes=32 << 20,          # blocks + constants << 32 MiB; safe on v7x
        ),
    )(x2, bmax, bsum)

    if pad:
        out2 = out2[: rows2 - pad]
    return out2.reshape(orig_shape)


if __name__ == "__main__":
    key = jax.random.PRNGKey(0)
    x = jax.random.normal(key, (2, 4, 16, 16), dtype=jnp.float32)

    out = softmax_last_dim(x)
    jax.block_until_ready(out)

    ref = jax.nn.softmax(x, axis=-1)
    assert out.shape == x.shape
    assert jnp.allclose(out, ref, atol=1e-3, rtol=1e-3), "mismatch vs reference"

    print("KERNEL_OK")
</pallas_src>

<mosaic_0001>
module attributes {stable_mosaic.version = 11 : i64} {
  func.func @_softmax_kernel(%arg0: i32, %arg1: memref<8x128xf32, #tpu.memory_space<vmem>>, %arg2: memref<8x128xf32, #tpu.memory_space<vmem>>, %arg3: memref<128x128xf32, #tpu.memory_space<vmem>>, %arg4: memref<8x128xf32, #tpu.memory_space<vmem>>) attributes {dimension_semantics = [#tpu.dimension_semantics<parallel>], iteration_bounds = array<i64: 2>, scalar_prefetch = 0 : i64, scratch_operands = 0 : i64, tpu.core_type = #tpu.core_type<tc>, window_params = [{transform_indices = @transform_0, window_bounds = array<i64: 8, 128>}, {pipeline_mode = #tpu.pipeline_mode<synchronous>, transform_indices = @transform_1, window_bounds = array<i64: 8, 128>}, {pipeline_mode = #tpu.pipeline_mode<synchronous>, transform_indices = @transform_2, window_bounds = array<i64: 128, 128>}, {transform_indices = @transform_3, window_bounds = array<i64: 8, 128>}]} {
    %c0 = arith.constant 0 : index
    %c0_0 = arith.constant 0 : index
    %0 = vector.load %arg1[%c0, %c0_0] : memref<8x128xf32, #tpu.memory_space<vmem>>, vector<8x128xf32>
    %1 = tpu.iota {dimensions = array<i32: 1>} : vector<1x8xi32>
    %cst = arith.constant 0.000000e+00 : f32
    %2 = vector.broadcast %cst : f32 to vector<8x8xf32>
    %c0_1 = arith.constant 0 : index
    %c0_2 = arith.constant 0 : index
    %3 = vector.load %arg1[%c0_1, %c0_2] : memref<8x128xf32, #tpu.memory_space<vmem>>, vector<8x16xf32>
    %cst_3 = arith.constant dense<0xFF800000> : vector<8xf32>
    %4 = vector.multi_reduction <maximumf>, %3, %cst_3 [1] : vector<8x16xf32> to vector<8xf32>
    %5 = vector.shape_cast %4 : vector<8xf32> to vector<8x1xf32>
    %c0_i32 = arith.constant 0 : i32
    %6 = vector.broadcast %c0_i32 : i32 to vector<1x8xi32>
    %7 = arith.cmpi eq, %1, %6 : vector<1x8xi32>
    %cst_4 = arith.constant 0.000000e+00 : f32
    %8 = vector.shape_cast %7 : vector<1x8xi1> to vector<1x8xi1>
    %9 = vector.broadcast %8 : vector<1x8xi1> to vector<8x8xi1>
    %10 = vector.shape_cast %5 : vector<8x1xf32> to vector<8x1xf32>
    %11 = vector.broadcast %10 : vector<8x1xf32> to vector<8x8xf32>
    %12 = vector.broadcast %cst_4 : f32 to vector<8x8xf32>
    %13 = arith.select %9, %11, %12 : vector<8x8xi1>, vector<8x8xf32>
    %14 = arith.addf %2, %13 : vector<8x8xf32>
    %c0_5 = arith.constant 0 : index
    %c16 = arith.constant 16 : index
    %15 = vector.load %arg1[%c0_5, %c16] : memref<8x128xf32, #tpu.memory_space<vmem>>, vector<8x16xf32>
    %cst_6 = arith.constant dense<0xFF800000> : vector<8xf32>
    %16 = vector.multi_reduction <maximumf>, %15, %cst_6 [1] : vector<8x16xf32> to vector<8xf32>
    %17 = vector.shape_cast %16 : vector<8xf32> to vector<8x1xf32>
    %c1_i32 = arith.constant 1 : i32
    %18 = vector.broadcast %c1_i32 : i32 to vector<1x8xi32>
    %19 = arith.cmpi eq, %1, %18 : vector<1x8xi32>
    %cst_7 = arith.constant 0.000000e+00 : f32
    %20 = vector.shape_cast %19 : vector<1x8xi1> to vector<1x8xi1>
    %21 = vector.broadcast %20 : vector<1x8xi1> to vector<8x8xi1>
    %22 = vector.shape_cast %17 : vector<8x1xf32> to vector<8x1xf32>
    %23 = vector.broadcast %22 : vector<8x1xf32> to vector<8x8xf32>
    %24 = vector.broadcast %cst_7 : f32 to vector<8x8xf32>
    %25 = arith.select %21, %23, %24 : vector<8x8xi1>, vector<8x8xf32>
    %26 = arith.addf %14, %25 : vector<8x8xf32>
    %c0_8 = arith.constant 0 : index
    %c32 = arith.constant 32 : index
    %27 = vector.load %arg1[%c0_8, %c32] : memref<8x128xf32, #tpu.memory_space<vmem>>, vector<8x16xf32>
    %cst_9 = arith.constant dense<0xFF800000> : vector<8xf32>
    %28 = vector.multi_reduction <maximumf>, %27, %cst_9 [1] : vector<8x16xf32> to vector<8xf32>
    %29 = vector.shape_cast %28 : vector<8xf32> to vector<8x1xf32>
    %c2_i32 = arith.constant 2 : i32
    %30 = vector.broadcast %c2_i32 : i32 to vector<1x8xi32>
    %31 = arith.cmpi eq, %1, %30 : vector<1x8xi32>
    %cst_10 = arith.constant 0.000000e+00 : f32
    %32 = vector.shape_cast %31 : vector<1x8xi1> to vector<1x8xi1>
    %33 = vector.broadcast %32 : vector<1x8xi1> to vector<8x8xi1>
    %34 = vector.shape_cast %29 : vector<8x1xf32> to vector<8x1xf32>
    %35 = vector.broadcast %34 : vector<8x1xf32> to vector<8x8xf32>
    %36 = vector.broadcast %cst_10 : f32 to vector<8x8xf32>
    %37 = arith.select %33, %35, %36 : vector<8x8xi1>, vector<8x8xf32>
    %38 = arith.addf %26, %37 : vector<8x8xf32>
    %c0_11 = arith.constant 0 : index
    %c48 = arith.constant 48 : index
    %39 = vector.load %arg1[%c0_11, %c48] : memref<8x128xf32, #tpu.memory_space<vmem>>, vector<8x16xf32>
    %cst_12 = arith.constant dense<0xFF800000> : vector<8xf32>
    %40 = vector.multi_reduction <maximumf>, %39, %cst_12 [1] : vector<8x16xf32> to vector<8xf32>
    %41 = vector.shape_cast %40 : vector<8xf32> to vector<8x1xf32>
    %c3_i32 = arith.constant 3 : i32
    %42 = vector.broadcast %c3_i32 : i32 to vector<1x8xi32>
    %43 = arith.cmpi eq, %1, %42 : vector<1x8xi32>
    %cst_13 = arith.constant 0.000000e+00 : f32
    %44 = vector.shape_cast %43 : vector<1x8xi1> to vector<1x8xi1>
    %45 = vector.broadcast %44 : vector<1x8xi1> to vector<8x8xi1>
    %46 = vector.shape_cast %41 : vector<8x1xf32> to vector<8x1xf32>
    %47 = vector.broadcast %46 : vector<8x1xf32> to vector<8x8xf32>
    %48 = vector.broadcast %cst_13 : f32 to vector<8x8xf32>
    %49 = arith.select %45, %47, %48 : vector<8x8xi1>, vector<8x8xf32>
    %50 = arith.addf %38, %49 : vector<8x8xf32>
    %c0_14 = arith.constant 0 : index
    %c64 = arith.constant 64 : index
    %51 = vector.load %arg1[%c0_14, %c64] : memref<8x128xf32, #tpu.memory_space<vmem>>, vector<8x16xf32>
    %cst_15 = arith.constant dense<0xFF800000> : vector<8xf32>
    %52 = vector.multi_reduction <maximumf>, %51, %cst_15 [1] : vector<8x16xf32> to vector<8xf32>
    %53 = vector.shape_cast %52 : vector<8xf32> to vector<8x1xf32>
    %c4_i32 = arith.constant 4 : i32
    %54 = vector.broadcast %c4_i32 : i32 to vector<1x8xi32>
    %55 = arith.cmpi eq, %1, %54 : vector<1x8xi32>
    %cst_16 = arith.constant 0.000000e+00 : f32
    %56 = vector.shape_cast %55 : vector<1x8xi1> to vector<1x8xi1>
    %57 = vector.broadcast %56 : vector<1x8xi1> to vector<8x8xi1>
    %58 = vector.shape_cast %53 : vector<8x1xf32> to vector<8x1xf32>
    %59 = vector.broadcast %58 : vector<8x1xf32> to vector<8x8xf32>
    %60 = vector.broadcast %cst_16 : f32 to vector<8x8xf32>
    %61 = arith.select %57, %59, %60 : vector<8x8xi1>, vector<8x8xf32>
    %62 = arith.addf %50, %61 : vector<8x8xf32>
    %c0_17 = arith.constant 0 : index
    %c80 = arith.constant 80 : index
    %63 = vector.load %arg1[%c0_17, %c80] : memref<8x128xf32, #tpu.memory_space<vmem>>, vector<8x16xf32>
    %cst_18 = arith.constant dense<0xFF800000> : vector<8xf32>
    %64 = vector.multi_reduction <maximumf>, %63, %cst_18 [1] : vector<8x16xf32> to vector<8xf32>
    %65 = vector.shape_cast %64 : vector<8xf32> to vector<8x1xf32>
    %c5_i32 = arith.constant 5 : i32
    %66 = vector.broadcast %c5_i32 : i32 to vector<1x8xi32>
    %67 = arith.cmpi eq, %1, %66 : vector<1x8xi32>
    %cst_19 = arith.constant 0.000000e+00 : f32
    %68 = vector.shape_cast %67 : vector<1x8xi1> to vector<1x8xi1>
    %69 = vector.broadcast %68 : vector<1x8xi1> to vector<8x8xi1>
    %70 = vector.shape_cast %65 : vector<8x1xf32> to vector<8x1xf32>
    %71 = vector.broadcast %70 : vector<8x1xf32> to vector<8x8xf32>
    %72 = vector.broadcast %cst_19 : f32 to vector<8x8xf32>
    %73 = arith.select %69, %71, %72 : vector<8x8xi1>, vector<8x8xf32>
    %74 = arith.addf %62, %73 : vector<8x8xf32>
    %c0_20 = arith.constant 0 : index
    %c96 = arith.constant 96 : index
    %75 = vector.load %arg1[%c0_20, %c96] : memref<8x128xf32, #tpu.memory_space<vmem>>, vector<8x16xf32>
    %cst_21 = arith.constant dense<0xFF800000> : vector<8xf32>
    %76 = vector.multi_reduction <maximumf>, %75, %cst_21 [1] : vector<8x16xf32> to vector<8xf32>
    %77 = vector.shape_cast %76 : vector<8xf32> to vector<8x1xf32>
    %c6_i32 = arith.constant 6 : i32
    %78 = vector.broadcast %c6_i32 : i32 to vector<1x8xi32>
    %79 = arith.cmpi eq, %1, %78 : vector<1x8xi32>
    %cst_22 = arith.constant 0.000000e+00 : f32
    %80 = vector.shape_cast %79 : vector<1x8xi1> to vector<1x8xi1>
    %81 = vector.broadcast %80 : vector<1x8xi1> to vector<8x8xi1>
    %82 = vector.shape_cast %77 : vector<8x1xf32> to vector<8x1xf32>
    %83 = vector.broadcast %82 : vector<8x1xf32> to vector<8x8xf32>
    %84 = vector.broadcast %cst_22 : f32 to vector<8x8xf32>
    %85 = arith.select %81, %83, %84 : vector<8x8xi1>, vector<8x8xf32>
    %86 = arith.addf %74, %85 : vector<8x8xf32>
    %c0_23 = arith.constant 0 : index
    %c112 = arith.constant 112 : index
    %87 = vector.load %arg1[%c0_23, %c112] : memref<8x128xf32, #tpu.memory_space<vmem>>, vector<8x16xf32>
    %cst_24 = arith.constant dense<0xFF800000> : vector<8xf32>
    %88 = vector.multi_reduction <maximumf>, %87, %cst_24 [1] : vector<8x16xf32> to vector<8xf32>
    %89 = vector.shape_cast %88 : vector<8xf32> to vector<8x1xf32>
    %c7_i32 = arith.constant 7 : i32
    %90 = vector.broadcast %c7_i32 : i32 to vector<1x8xi32>
    %91 = arith.cmpi eq, %1, %90 : vector<1x8xi32>
    %cst_25 = arith.constant 0.000000e+00 : f32
    %92 = vector.shape_cast %91 : vector<1x8xi1> to vector<1x8xi1>
    %93 = vector.broadcast %92 : vector<1x8xi1> to vector<8x8xi1>
    %94 = vector.shape_cast %89 : vector<8x1xf32> to vector<8x1xf32>
    %95 = vector.broadcast %94 : vector<8x1xf32> to vector<8x8xf32>
    %96 = vector.broadcast %cst_25 : f32 to vector<8x8xf32>
    %97 = arith.select %93, %95, %96 : vector<8x8xi1>, vector<8x8xf32>
    %98 = arith.addf %86, %97 : vector<8x8xf32>
    %c0_26 = arith.constant 0 : index
    %c0_27 = arith.constant 0 : index
    %99 = vector.load %arg2[%c0_26, %c0_27] : memref<8x128xf32, #tpu.memory_space<vmem>>, vector<8x128xf32>
    %cst_28 = arith.constant dense<0.000000e+00> : vector<8x128xf32>
    %100 = tpu.matmul %98, %99, %cst_28 {dimension_numbers = #tpu.dot_dimension_numbers<[1], [0], [0], [1], [0, 0, 1, 1], [], []>, precision = #tpu.contract_precision<fp32>} : vector<8x8xf32>, vector<8x128xf32>, vector<8x128xf32> -> vector<8x128xf32>
    %101 = arith.subf %0, %100 : vector<8x128xf32>
    %102 = math.exp %101 : vector<8x128xf32>
    %c0_29 = arith.constant 0 : index
    %c0_30 = arith.constant 0 : index
    %103 = vector.load %arg3[%c0_29, %c0_30] : memref<128x128xf32, #tpu.memory_space<vmem>>, vector<128x128xf32>
    %cst_31 = arith.constant dense<0.000000e+00> : vector<8x128xf32>
    %104 = tpu.matmul %102, %103, %cst_31 {dimension_numbers = #tpu.dot_dimension_numbers<[1], [0], [0], [1], [0, 0, 1, 1], [], []>, precision = #tpu.contract_precision<fp32>} : vector<8x128xf32>, vector<128x128xf32>, vector<8x128xf32> -> vector<8x128xf32>
    %105 = arith.divf %102, %104 : vector<8x128xf32>
    %c0_32 = arith.constant 0 : index
    %c0_33 = arith.constant 0 : index
    %106 = vector.load %arg4[%c0_32, %c0_33] : memref<8x128xf32, #tpu.memory_space<vmem>>, vector<8x128xf32>
    tpu.vector_store %arg4[%c0_32, %c0_33], %105 {strides = array<i32>} : memref<8x128xf32, #tpu.memory_space<vmem>>, vector<8x128xf32>,
    return
  }
  func.func @transform_0(%arg0: i32) -> (i32, i32) {
    %c0_i32 = arith.constant 0 : i32
    %c0_i32_0 = arith.constant 0 : i32
    return %arg0, %c0_i32 : i32, i32
  }
  func.func @transform_1(%arg0: i32) -> (i32, i32) {
    %c0_i32 = arith.constant 0 : i32
    %c0_i32_0 = arith.constant 0 : i32
    %c0_i32_1 = arith.constant 0 : i32
    return %c0_i32, %c0_i32_0 : i32, i32
  }
  func.func @transform_2(%arg0: i32) -> (i32, i32) {
    %c0_i32 = arith.constant 0 : i32
    %c0_i32_0 = arith.constant 0 : i32
    %c0_i32_1 = arith.constant 0 : i32
    return %c0_i32, %c0_i32_0 : i32, i32
  }
  func.func @transform_3(%arg0: i32) -> (i32, i32) {
    %c0_i32 = arith.constant 0 : i32
    %c0_i32_0 = arith.constant 0 : i32
    return %arg0, %c0_i32 : i32, i32
  }
}

</mosaic_0001>

<bundles_post_ra>
// kernel: tpu_custom_call.1
= control target key start
LH: loop header
LB: loop body
LE: loop exit
PB: predicated region body
PF: predicated region fallthrough
CT: control target
= control target key end

     0   :  { %8 = vsyncpa [#allocation3], 0  ;;  %s1575_s0 = inlined_call_operand.hbm [shape: f32[16,128], index: 0, kind: input, shape index: {}]   ;;  %s1576_s1 = inlined_call_operand.hbm [shape: f32[8,128], index: 1, kind: input, shape index: {}]   ;;  %s1577_s2 = inlined_call_operand.hbm [shape: f32[128,128], index: 2, kind: input, shape index: {}]   ;;  %s1578_s3 = inlined_call_operand.hbm [shape: f32[16,128], index: 3, kind: output, shape index: {}]  }
   0x1   :  { %10 = vsyncpa [#allocation3 + $0x1], 0 }
   0x2   :  { %11 = vsyncpa [#allocation6], 0 }
   0x3   :  { %12 = vsyncpa [#allocation4], 0 }
   0x4   :  { %14 = vsyncpa [#allocation4 + $0x1], 0  ;;  %s1201_s12 = smov 0   ;;  %s1203_s13 = smov 0  }
   0x5   :  { %s1205_s14 = smov 0   ;;  %s1207_s15 = smov 0  }
   0x6 LB: > { %s1222_s16 = sadd.s32 4294967295, %s1175_s15   ;;  %s926_s17 = sadd.s32 4294967294, %s1175_s15   ;;  %s1175_s15 = sphi %s1207_s15, %s1588_s15   ;;  %s1171_s14 = sphi %s1205_s14, %s1587_s14   ;;  %s1167_s13 = sphi %s1203_s13, %s1586_s13   ;;  %s1163_s12 = sphi %s1201_s12, %s1585_s12  }
   0x7   : > { %p40_p0 = scmp.ne.s32.totalorder %s1167_s13, %s1163_s12  ;;  %p41_p1 = scmp.eq.s32.totalorder %s1222_s16, 0 }
   0x8   : > { %p106_p2 = scmp.eq.s32.totalorder %s1222_s16, 1  ;;  %p112_p3 = scmp.eq.s32.totalorder %s926_s17, 1 }
   0x9   : > { %p1231_p4 = por %p41_p1, %p40_p0  ;;  %p927_p5 = scmp.ge.s32.totalorder %s1175_s15, 1 }
   0xa   : > { %p1236_p6 = por %p112_p3, %p40_p0  ;;  %p119_p7 = scmp.lt.s32.totalorder %s1175_s15, 3 }
   0xb   : > { %s131_s22 = sshll.u32 %s1576_s1, 4  ;;  %s1177_s24 = smov [#allocation5]   ;;  %s132_s22 = int_to_ptr.hbm [resolvable:$true] %s131_s22 }
   0xc   : > { %p1244_p8 = pnand %p927_p5, %p119_p7  ;;  %s133_s25 = sshll.u32 %s1177_s24, 4  ;;  %s134_s25 = int_to_ptr.vmem [resolvable:$true] %s133_s25 }
   0xd   : > { %s142_s28 = sshll.u32 %s1577_s2, 4  ;;  %s1178_s29 = smov [#allocation7]   ;;  %s143_s28 = int_to_ptr.hbm [resolvable:$true] %s142_s28 }
   0xe   : > { %p954_p10 = pneg %p1244_p8  ;;  %s144_s30 = sshll.u32 %s1178_s29, 4  ;;  %s145_s30 = int_to_ptr.vmem [resolvable:$true] %s144_s30 }
   0xf   : > { %s1179_s4 = smov 128   ;;  %s1180_s5 = smov 8  }
  0x10   : > { %p955_p11 = pnand %p954_p10, %p41_p1  ;;  %s1257_s6 = sadd.s32 1, %s1175_s15  }
  0x11   : > { %s24_s7 = ssub.s32 %s1175_s15, %s1257_s6  ;;  %s27_s8 = sadd.s32 1, %s1171_s14 }
  0x12   : > { %957 = dma.hbm_to_vmem [thread:$0]  (!%p955_p11), %s132_s22, 128, %s134_s25, [#allocation6]  }
  0x13   : > { %960 = dma.hbm_to_vmem [thread:$0]  (!%p955_p11), %s143_s28, 2048, %s145_s30, [#allocation6], %s1179_s4, %s1179_s4, %s1180_s5  }
  0x14   : > { %p25_p12 = scmp.eq.s32.totalorder %s24_s7, 0  ;;  %p34_p13 = scmp.ne.s32.totalorder %s1171_s14, %s1167_s13 }
  0x15   : > { %p35_p0 = scmp.eq.s32.totalorder %s1175_s15, 0  ;;  %p971_p7 = scmp.lt.s32.totalorder %s1175_s15, 2 }
  0x16   : > { %s1266_s9 = scalar_select %p25_p12, %s1171_s14, %s27_s8  }
  0x17   : > { %p36_p3 = por %p35_p0, %p34_p13  ;;  %p1270_p5 = por %p106_p2, %p34_p13 }
  0x18   : > { %s158_s11 = sand.u32 1, %s1171_s14   ;;  %s932_s20 = sshll.u32 %s1175_s15, 3 }
  0x19   : > { %s931_s17 = sshll.u32 %s158_s11, 3  ;;  %s166_s24 = scalar_lea.hbm %s1575_s0, %s932_s20 }
  0x1a   : > { %s162_s25 = scalar_lea.vmem [#allocation2], %s931_s17  ;;  %s168_s27 = sshll.u32 %s166_s24, 4  ;;  %s169_s27 = int_to_ptr.hbm [resolvable:$true] %s168_s27 }
  0x1b   : > { %s170_s26 = sshll.u32 %s162_s25, 4  ;;  %p1280_p10 = pnand %p971_p7, %p36_p3  ;;  %s171_s26 = int_to_ptr.vmem [resolvable:$true] %s170_s26 }
  0x1c   : > { %s159_s29 = scalar_lea.sflag [#allocation3], %s158_s11  ;;  %s1075_s30 = sshra.s32 %s169_s27, 4  ;;  %s1076_s30 = int_to_ptr.hbm [resolvable:$true] %s1075_s30 }
  0x1d   : > { %s1077_s4 = scalar_lea.hbm %s1076_s30, 8  ;;  %p1079_p11 = pneg %p1280_p10 }
  0x1e   : > { %p1078_p2 = scmp.ne.s32.totalorder %s1076_s30, %s1077_s4  ;;  %s1082_s8 = scalar_lea.hbm %s1575_s0, 16 }
  0x1f   : > { %p1083_p0 = scmp.lt.s32.totalorder %s1076_s30, %s1575_s0  ;;  %p1084_p3 = scmp.lt.s32.totalorder %s1082_s8, %s1077_s4 }
  0x20   : > { %p1080_p12 = pnand %p1079_p11, %p1078_p2 }
  0x21   : > { %p1085_p7 = por %p1084_p3, %p1083_p0 }
  0x22   : > { %p1081_p13 = pneg %p1080_p12 }
  0x24   : > { %p1086_p9 = pnand %p1085_p7, %p1081_p13 }
  0x26   : > { %1089 = shalt.err (!%p1086_p9)
}
  0x27   : > { %964 = dma.hbm_to_vmem [thread:$0]  (!%p1280_p10), %s169_s27, 128, %s171_s26, %s159_s29  }
  0x28   : > { %179 = sbr.rel (%p1244_p8) target bundleno = 533 (0x215), region = 32  ;;  %s1297_s11 = sand.u32 (!%p1244_p8), 1, %s1167_s13  }
  0x29   : > { %s934_s21 = sshll.u32 (!%p1244_p8), %s1297_s11, 3  ;;  %s182_s22 = scalar_lea.sflag (!%p1244_p8), [#allocation3], %s1297_s11 }
  0x2a   : > { %s185_s24 = scalar_lea.vmem (!%p1244_p8), [#allocation2], %s934_s21 }
  0x2d   : > { %1150 = dma.done.wait (%p1231_p4), %s182_s22, 128  }
  0x2e   : > { %1152 = vsyncadd (%p1231_p4), %s182_s22, 4294967168 }
  0x2f   : > { %1154 = dma.done.wait (%p41_p1), [#allocation6], 2176  }
  0x30   : > { %1156 = vsyncadd (%p41_p1), [#allocation6], 4294965120  ;;  %vm222_vm0 = vcmask 130048   ;;  %vm240_vm1 = vcmask 392448   ;;  %vm258_vm2 = vcmask 654848   ;;  %v1311_v0 = vld [vmem:[%s185_s24] sm:$0xff]  ;;  %v220_v15 = vlaneseq }
  0x31   : > { %v223_v1 = vsel %vm222_vm0, %v1311_v0, -inf  ;;  %v241_v2 = vsel %vm240_vm1, %v1311_v0, -inf  ;;  %v259_v3 = vsel %vm258_vm2, %v1311_v0, -inf  ;;  %vm231_vm3 = vcmask 261248   ;;  %v294_v9 = vld [vmem:[#allocation5] sm:$0xff]  ;;  %v462_v39 = vld [vmem:[#allocation7 + $0x70] sm:$0xff] }
  0x32   : > { %224 = vmax.xlane.f32.xlu0 %v223_v1  ;;  %242 = vmax.xlane.f32.xlu1 %v241_v2  ;;  %vm249_vm4 = vcmask 523648   ;;  %vm267_vm5 = vcmask 786048   ;;  %v232_v4 = vsel %vm231_vm3, %v1311_v0, -inf  ;;  %vm276_vm6 = vcmask 917248   ;;  %v463_v38 = vld [vmem:[#allocation7 + $0x78] sm:$0xff]  ;;  %v461_v40 = vld [vmem:[#allocation7 + $0x68] sm:$0xff] }
  0x33   : > { %260 = vmax.xlane.f32.xlu2 %v259_v3  ;;  %v250_v5 = vsel %vm249_vm4, %v1311_v0, -inf  ;;  %v268_v6 = vsel %vm267_vm5, %v1311_v0, -inf  ;;  %vm285_vm7 = vcmask 1048448   ;;  %v277_v7 = vsel %vm276_vm6, %v1311_v0, -inf  ;;  %v460_v45 = vld [vmem:[#allocation7 + $0x60] sm:$0xff]  ;;  %v459_v46 = vld [vmem:[#allocation7 + $0x58] sm:$0xff] }
  0x34   : > { %v286_v8 = vsel %vm285_vm7, %v1311_v0, -inf  ;;  %v1321_v10 = vand.u32 4294901760, %v294_v9  ;;  %v221_v18 = vand.u32 127, %v220_v15  ;;  %v1333_v42 = vand.u32 4294901760, %v463_v38  ;;  %v458_v47 = vld [vmem:[#allocation7 + $0x50] sm:$0xff]  ;;  %s939_s18 = sshll.u32 %s1222_s16, 3 }
  0x35   : > { %v1335_v43 = vand.u32 4294901760, %v462_v39  ;;  %v1337_v44 = vand.u32 4294901760, %v461_v40  ;;  %vm295_vm0 = vcmask 64512   ;;  %v1339_v48 = vand.u32 4294901760, %v460_v45  ;;  %s832_s26 = scalar_lea.hbm %s1578_s3, %s939_s18  ;;  %s218_s27 = scalar_lea.vmem [#allocation8], %s934_s21 }
  0x36   : > { %v1324_v11 = vsub.f32 %v294_v9, %v1321_v10  ;;  %315 = vmatpush.msra.mxu0 %v1321_v10  ;;  %vm226_vm8 = vcmp.eq.s32.totalorder %v221_v18, 0  ;;  %vm235_vm9 = vcmp.eq.s32.totalorder %v221_v18, 1  ;;  %vm244_vm10 = vcmp.eq.s32.totalorder %v221_v18, 2  ;;  %465 = vmatpush.msra.mxu2 %v1333_v42  ;;  %s834_s28 = sshll.u32 %s218_s27, 4  ;;  %s836_s29 = sshll.u32 %s832_s26, 4  ;;  %s835_s28 = int_to_ptr.vmem [resolvable:$true] %s834_s28  ;;  %s837_s29 = int_to_ptr.hbm [resolvable:$true] %s836_s29 }
  0x37   : > { %vm253_vm11 = vcmp.eq.s32.totalorder %v221_v18, 3  ;;  %vm262_vm12 = vcmp.eq.s32.totalorder %v221_v18, 4  ;;  %vm271_vm13 = vcmp.eq.s32.totalorder %v221_v18, 5  ;;  %vm280_vm14 = vcmp.eq.s32.totalorder %v221_v18, 6  ;;  %s822_s16 = scalar_lea.sflag [#allocation4], %s1297_s11  ;;  %s1119_s30 = sshra.s32 %s837_s29, 4  ;;  %s1120_s30 = int_to_ptr.hbm [resolvable:$true] %s1119_s30 }
  0x38   : > { %v342_v12 = vand.u32 4294901760, %v1324_v11  ;;  %368 = vmatpush.msrb.mxu0 %v1324_v11  ;;  %vm289_vm15 = vcmp.eq.s32.totalorder %v221_v18, 7  ;;  %v1341_v49 = vand.u32 4294901760, %v459_v46  ;;  %v1343_v50 = vand.u32 4294901760, %v458_v47  ;;  %467 = vmatpush.msra.mxu2 %v1335_v43  ;;  %s1121_s4 = scalar_lea.hbm %s1120_s30, 8  ;;  %s1125_s8 = scalar_lea.hbm %s1578_s3, 16 }
  0x39   : > { %v1346_v52 = vsub.f32 %v463_v38, %v1333_v42  ;;  %v1349_v53 = vsub.f32 %v462_v39, %v1335_v43  ;;  %v1352_v54 = vsub.f32 %v461_v40, %v1337_v44  ;;  %v1356_v55 = vsub.f32 %v460_v45, %v1339_v48  ;;  %v452_v39 = vld [vmem:[#allocation7 + $0x20] sm:$0xff]  ;;  %p1122_p1 = scmp.ne.s32.totalorder %s1120_s30, %s1121_s4  ;;  %p1126_p9 = scmp.lt.s32.totalorder %s1120_s30, %s1578_s3 }
  0x3a   : > { %233 = vmax.xlane.f32.xlu0 %v232_v4  ;;  %251 = vmax.xlane.f32.xlu1 %v250_v5  ;;  %v343_v13 = vsub.f32 %v1324_v11, %v342_v12  ;;  %v1359_v56 = vsub.f32 %v459_v46, %v1341_v49  ;;  %v1362_v57 = vsub.f32 %v458_v47, %v1343_v50  ;;  %v457_v11 = vld [vmem:[#allocation7 + $0x48] sm:$0xff]  ;;  %v1454_v46 = vand.u32 4294901760, %v452_v39  ;;  %p1127_p10 = scmp.lt.s32.totalorder %s1125_s8, %s1121_s4 }
  0x3b   : > { %269 = vmax.xlane.f32.xlu2 %v268_v6  ;;  %v507_v59 = vand.u32 4294901760, %v1346_v52  ;;  %v513_v60 = vand.u32 4294901760, %v1349_v53  ;;  %v519_v61 = vand.u32 4294901760, %v1352_v54  ;;  %v525_v63 = vand.u32 4294901760, %v1356_v55  ;;  %469 = vmatpush.msra.mxu2 %v1337_v44  ;;  %p1123_p4 = pnand %p1122_p1, %p1270_p5 }
  0x3c   : > { %v344_v14 = vand.u32 4294901760, %v343_v13  ;;  %v531_v4 = vand.u32 4294901760, %v1359_v56  ;;  %v537_v9 = vand.u32 4294901760, %v1362_v57  ;;  %p1128_p2 = por %p1127_p10, %p1126_p9 }
  0x3d   : > { %v508_v1 = vsub.f32 %v1346_v52, %v507_v59  ;;  %v514_v2 = vsub.f32 %v1349_v53, %v513_v60  ;;  %v520_v3 = vsub.f32 %v1352_v54, %v519_v61  ;;  %471 = vmatpush.msra.mxu2 %v1339_v48  ;;  %p1124_p8 = pneg %p1123_p4 }
  0x3e   : > { %345 = vmatpush.msra.mxu1 %v344_v14  ;;  %v532_v15 = vsub.f32 %v1359_v56, %v531_v4 }
  0x3f   : > { %v509_v6 = vand.u32 4294901760, %v508_v1  ;;  %v521_v14 = vand.u32 4294901760, %v520_v3  ;;  %473 = vmatpush.msra.mxu2 %v1341_v49  ;;  %v1466_v1 = vsub.f32 %v452_v39, %v1454_v46  ;;  %p1129_p11 = pnand %p1128_p2, %p1124_p8 }
  0x40   : > { %391 = vmatpush.msrb.mxu1 %v1321_v10 }
  0x41   : > { %510 = vmatpush.msra.mxu3 %v509_v6  ;;  %475 = vmatpush.msra.mxu2 %v1343_v50 }
  0x42   : > { %278 = vmax.xlane.f32.xlu0 %v277_v7  ;;  %287 = vmax.xlane.f32.xlu1 %v286_v8  ;;  %v515_v7 = vand.u32 4294901760, %v514_v2  ;;  %v526_v8 = vsub.f32 %v1356_v55, %v525_v63 }
  0x44   : > { %516 = vmatpush.msra.mxu3 %v515_v7  ;;  %v573_v7 = vand.u32 4294901760, %v1466_v1 }
  0x46   : > { %522 = vmatpush.msra.mxu3 %v521_v14 }
  0xa5   : > { %v225_v16 = vpop.xlane.xlu0 %224  ;;  %v243_v17 = vpop.xlane.xlu1 %242 }
  0xa6   : > { %v261_v19 = vpop.xlane.xlu2 %260  ;;  %v229_v22 = vsel %vm226_vm8, %v225_v16, 0.0  ;;  %v247_v25 = vsel %vm244_vm10, %v243_v17, 0.0  ;;  %v527_v16 = vand.u32 4294901760, %v526_v8  ;;  %v538_v17 = vsub.f32 %v1362_v57, %v537_v9 }
  0xa7   : > { %v265_v30 = vsel %vm262_vm12, %v261_v19, 0.0  ;;  %v533_v19 = vand.u32 4294901760, %v532_v15  ;;  %v449_v15 = vld [vmem:[#allocation7 + $0x8] sm:$0xff] }
  0xa8   : > { %528 = vmatpush.msra.mxu3 %v527_v16 }
  0xaa   : > { %534 = vmatpush.msra.mxu3 %v533_v19 }
  0xad   : > { %v234_v20 = vpop.xlane.xlu0 %233  ;;  %v252_v21 = vpop.xlane.xlu1 %251 }
  0xae   : > { %v238_v23 = vsel %vm235_vm9, %v234_v20, 0.0  ;;  %v256_v26 = vsel %vm253_vm11, %v252_v21, 0.0  ;;  %v270_v28 = vpop.xlane.xlu2 %269  ;;  %v539_v20 = vand.u32 4294901760, %v538_v17  ;;  %v456_v21 = vld [vmem:[#allocation7 + $0x40] sm:$0xff] }
  0xaf   : > { %v239_v24 = vadd.f32 %v238_v23, %v229_v22  ;;  %v274_v31 = vsel %vm271_vm13, %v270_v28, 0.0  ;;  %v1413_v23 = vand.u32 4294901760, %v456_v21  ;;  %v454_v28 = vld [vmem:[#allocation7 + $0x30] sm:$0xff] }
  0xb0   : > { %540 = vmatpush.msra.mxu3 %v539_v20  ;;  %v448_v20 = vld [vmem:[#allocation7] sm:$0xff] }
  0xb1   : > { %v248_v27 = vadd.f32 %v247_v25, %v239_v24  ;;  %v455_v24 = vld [vmem:[#allocation7 + $0x38] sm:$0xff] }
  0xb3   : > { %v257_v29 = vadd.f32 %v256_v26, %v248_v27  ;;  %v1419_v26 = vsub.f32 %v456_v21, %v1413_v23  ;;  %v1421_v27 = vand.u32 4294901760, %v455_v24 }
  0xb5   : > { %v266_v32 = vadd.f32 %v265_v30, %v257_v29  ;;  %v279_v33 = vpop.xlane.xlu0 %278  ;;  %v288_v34 = vpop.xlane.xlu1 %287  ;;  %v549_v30 = vand.u32 4294901760, %v1419_v26 }
  0xb6   : > { %v283_v35 = vsel %vm280_vm14, %v279_v33, 0.0  ;;  %v292_v37 = vsel %vm289_vm15, %v288_v34, 0.0  ;;  %v453_v33 = vld [vmem:[#allocation7 + $0x28] sm:$0xff] }
  0xb7   : > { %v275_v36 = vadd.f32 %v274_v31, %v266_v32  ;;  %v1431_v31 = vsub.f32 %v455_v24, %v1421_v27  ;;  %v1433_v32 = vand.u32 4294901760, %v454_v28  ;;  %v1447_v38 = vand.u32 4294901760, %v453_v33 }
  0xb9   : > { %v284_v41 = vadd.f32 %v283_v35, %v275_v36  ;;  %v550_v35 = vsub.f32 %v1419_v26, %v549_v30  ;;  %v555_v36 = vand.u32 4294901760, %v1431_v31  ;;  %v1458_v47 = vsub.f32 %v453_v33, %v1447_v38 }
  0xbb   : > { %v293_v51 = vadd.f32 %v292_v37, %v284_v41  ;;  %v1443_v37 = vsub.f32 %v454_v28, %v1433_v32  ;;  %v551_v40 = vand.u32 4294901760, %v550_v35  ;;  %v556_v41 = vsub.f32 %v1431_v31, %v555_v36 }
  0xbc   : > { %v567_v3 = vand.u32 4294901760, %v1458_v47 }
  0xbd   : > { %v297_v58 = vsel %vm295_vm0, %v293_v51, 0  ;;  %v561_v45 = vand.u32 4294901760, %v1443_v37  ;;  %v451_v51 = vld [vmem:[#allocation7 + $0x18] sm:$0xff] }
  0xbe   : > { %v316_v62 = vand.u32 4294901760, %v297_v58  ;;  %v1468_v2 = vand.u32 4294901760, %v451_v51  ;;  %v568_v14 = vsub.f32 %v1458_v47, %v567_v3 }
  0xc0   : > { %v317_v5 = vsub.f32 %v297_v58, %v316_v62  ;;  %347 = vmatmul.f32.vlgmr.msra.gmra.mxu1 %v316_v62  ;;  %v557_v58 = vand.u32 4294901760, %v556_v41  ;;  %v1475_v8 = vsub.f32 %v451_v51, %v1468_v2  ;;  %v569_v19 = vand.u32 4294901760, %v568_v14 }
  0xc1   : > { %439 = vmatpush.msra.mxu1 %v1321_v10 }
  0xc2   : > { %v318_v13 = vand.u32 4294901760, %v317_v5  ;;  %v579_v16 = vand.u32 4294901760, %v1475_v8 }
  0xc4   : > { %v319_v10 = vsub.f32 %v317_v5, %v318_v13  ;;  %v580_v21 = vsub.f32 %v1475_v8, %v579_v16 }
  0xc6   : > { %v320_v18 = vand.u32 4294901760, %v319_v10  ;;  %v574_v10 = vsub.f32 %v1466_v1, %v573_v7  ;;  %v581_v33 = vand.u32 4294901760, %v580_v21 }
  0xc8   : > { %321 = vmatmul.f32.vlgmr.msra.gmra.mxu0 %v320_v18  ;;  %395 = vmatmul.f32.vlgmr.msrb.gmra.mxu1 %v318_v13  ;;  %v1490_v18 = vand.u32 4294901760, %v449_v15 }
  0xc9   : > { %417 = vmatpush.msra.mxu0 %v342_v12  ;;  %661 = vmatpush.msrb.mxu1 %v1333_v42  ;;  %v1408_v12 = vand.u32 4294901760, %v457_v11 }
  0xca   : > { %v590_v28 = vsub.f32 %v449_v15, %v1490_v18 }
  0xcb   : > { %663 = vmatpush.msrb.mxu1 %v1335_v43  ;;  %v1411_v22 = vsub.f32 %v457_v11, %v1408_v12  ;;  %477 = vmatpush.msra.mxu2 %v1408_v12  ;;  %v575_v11 = vand.u32 4294901760, %v574_v10 }
  0xcc   : > { %v591_v35 = vand.u32 4294901760, %v590_v28 }
  0xcd   : > { %665 = vmatpush.msrb.mxu1 %v1337_v44  ;;  %v543_v25 = vand.u32 4294901760, %v1411_v22  ;;  %479 = vmatpush.msra.mxu2 %v1413_v23 }
  0xce   : > { %v592_v41 = vsub.f32 %v590_v28, %v591_v35 }
  0xcf   : > { %667 = vmatpush.msrb.mxu1 %v1339_v48  ;;  %v544_v29 = vsub.f32 %v1411_v22, %v543_v25  ;;  %481 = vmatpush.msra.mxu2 %v1421_v27 }
  0xd0   : > { %371 = vmatmul.f32.vlgmr.msrb.gmra.mxu0 %v317_v5  ;;  %441 = vmatmul.f32.vlgmr.msra.gmra.mxu1 %v316_v62  ;;  %v450_v5 = vld [vmem:[#allocation7 + $0x10] sm:$0xff] }
  0xd1   : > { %608 = vmatpush.msrb.mxu0 %v1346_v52  ;;  %669 = vmatpush.msrb.mxu1 %v1341_v49  ;;  %v545_v34 = vand.u32 4294901760, %v544_v29  ;;  %v1477_v13 = vand.u32 4294901760, %v450_v5  ;;  %v494_v29 = vand.u32 4294901760, %v448_v20 }
  0xd2   : > { %483 = vmatpush.msra.mxu2 %v1433_v32 }
  0xd3   : > { %611 = vmatpush.msrb.mxu0 %v1349_v53  ;;  %671 = vmatpush.msrb.mxu1 %v1343_v50  ;;  %v584_v17 = vsub.f32 %v450_v5, %v1477_v13  ;;  %v596_v39 = vsub.f32 %v448_v20, %v494_v29 }
  0xd4   : > { %546 = vmatpush.msra.mxu3 %v545_v34  ;;  %485 = vmatpush.msra.mxu2 %v1447_v38 }
  0xd5   : > { %614 = vmatpush.msrb.mxu0 %v1352_v54  ;;  %673 = vmatpush.msrb.mxu1 %v1408_v12  ;;  %v585_v24 = vand.u32 4294901760, %v584_v17  ;;  %v597_v51 = vand.u32 4294901760, %v596_v39 }
  0xd6   : > { %552 = vmatpush.msra.mxu3 %v551_v40  ;;  %487 = vmatpush.msra.mxu2 %v1454_v46 }
  0xd7   : > { %617 = vmatpush.msrb.mxu0 %v1356_v55  ;;  %675 = vmatpush.msrb.mxu1 %v1413_v23  ;;  %v586_v34 = vsub.f32 %v584_v17, %v585_v24 }
  0xd8   : > { %419 = vmatmul.f32.vlgmr.msra.gmra.mxu0 %v316_v62  ;;  %v562_v62 = vsub.f32 %v1443_v37, %v561_v45  ;;  %558 = vmatpush.msra.mxu3 %v557_v58  ;;  %v593_v58 = vand.u32 4294901760, %v592_v41 }
  0xd9   : > { %620 = vmatpush.msrb.mxu0 %v1359_v56  ;;  %677 = vmatpush.msrb.mxu1 %v1421_v27  ;;  %v587_v40 = vand.u32 4294901760, %v586_v34 }
  0xda   : > { %v563_v6 = vand.u32 4294901760, %v562_v62  ;;  %489 = vmatpush.msra.mxu2 %v1468_v2  ;;  %v598_v62 = vsub.f32 %v596_v39, %v597_v51 }
  0xdb   : > { %623 = vmatpush.msrb.mxu0 %v1362_v57  ;;  %679 = vmatpush.msrb.mxu1 %v1433_v32 }
  0xdc   : > { %564 = vmatpush.msra.mxu3 %v563_v6  ;;  %491 = vmatpush.msra.mxu2 %v1477_v13  ;;  %v599_v5 = vand.u32 4294901760, %v598_v62 }
  0xdd   : > { %626 = vmatpush.msrb.mxu0 %v1411_v22  ;;  %681 = vmatpush.msrb.mxu1 %v1447_v38 }
  0xde   : > { %570 = vmatpush.msra.mxu3 %v569_v19  ;;  %493 = vmatpush.msra.mxu2 %v1490_v18 }
  0xdf   : > { %629 = vmatpush.msrb.mxu0 %v1419_v26  ;;  %683 = vmatpush.msrb.mxu1 %v1454_v46 }
  0xe0   : > { %576 = vmatpush.msra.mxu3 %v575_v11  ;;  %495 = vmatpush.msra.mxu2 %v494_v29 }
  0xe1   : > { %632 = vmatpush.msrb.mxu0 %v1431_v31  ;;  %685 = vmatpush.msrb.mxu1 %v1468_v2 }
  0xe2   : > { %702 = vmatpush.msrb.mxu2 %v507_v59  ;;  %582 = vmatpush.msra.mxu3 %v581_v33 }
  0xe3   : > { %635 = vmatpush.msrb.mxu0 %v1443_v37  ;;  %687 = vmatpush.msrb.mxu1 %v1477_v13 }
  0xe4   : > { %706 = vmatpush.msrb.mxu2 %v513_v60  ;;  %588 = vmatpush.msra.mxu3 %v587_v40 }
  0xe5   : > { %638 = vmatpush.msrb.mxu0 %v1458_v47  ;;  %689 = vmatpush.msrb.mxu1 %v1490_v18 }
  0xe6   : > { %710 = vmatpush.msrb.mxu2 %v519_v61  ;;  %594 = vmatpush.msra.mxu3 %v593_v58 }
  0xe7   : > { %641 = vmatpush.msrb.mxu0 %v1466_v1  ;;  %691 = vmatpush.msrb.mxu1 %v494_v29 }
  0xe8   : > { %714 = vmatpush.msrb.mxu2 %v525_v63  ;;  %600 = vmatpush.msra.mxu3 %v599_v5 }
  0xe9   : > { %644 = vmatpush.msrb.mxu0 %v1475_v8 }
  0xea   : > { %769 = vmatpush.msrb.mxu3 %v1333_v42  ;;  %718 = vmatpush.msrb.mxu2 %v531_v4 }
  0xeb   : > { %647 = vmatpush.msrb.mxu0 %v584_v17 }
  0xec   : > { %771 = vmatpush.msrb.mxu3 %v1335_v43  ;;  %722 = vmatpush.msrb.mxu2 %v537_v9 }
  0xed   : > { %650 = vmatpush.msrb.mxu0 %v590_v28 }
  0xee   : > { %773 = vmatpush.msrb.mxu3 %v1337_v44  ;;  %726 = vmatpush.msrb.mxu2 %v543_v25 }
  0xef   : > { %653 = vmatpush.msrb.mxu0 %v596_v39 }
  0xf0   : > { %775 = vmatpush.msrb.mxu3 %v1339_v48  ;;  %730 = vmatpush.msrb.mxu2 %v549_v30 }
  0xf2   : > { %777 = vmatpush.msrb.mxu3 %v1341_v49  ;;  %734 = vmatpush.msrb.mxu2 %v555_v36 }
  0xf4   : > { %779 = vmatpush.msrb.mxu3 %v1343_v50  ;;  %738 = vmatpush.msrb.mxu2 %v561_v45 }
  0xf6   : > { %781 = vmatpush.msrb.mxu3 %v1408_v12  ;;  %742 = vmatpush.msrb.mxu2 %v567_v3 }
  0xf8   : > { %783 = vmatpush.msrb.mxu3 %v1413_v23  ;;  %746 = vmatpush.msrb.mxu2 %v573_v7 }
  0xfa   : > { %785 = vmatpush.msrb.mxu3 %v1421_v27  ;;  %750 = vmatpush.msrb.mxu2 %v579_v16 }
  0xfc   : > { %787 = vmatpush.msrb.mxu3 %v1433_v32  ;;  %754 = vmatpush.msrb.mxu2 %v585_v24 }
  0xfe   : > { %789 = vmatpush.msrb.mxu3 %v1447_v38  ;;  %758 = vmatpush.msrb.mxu2 %v591_v35 }
 0x100   : > { %791 = vmatpush.msrb.mxu3 %v1454_v46  ;;  %762 = vmatpush.msrb.mxu2 %v597_v51 }
 0x102   : > { %793 = vmatpush.msrb.mxu3 %v1468_v2 }
 0x104   : > { %795 = vmatpush.msrb.mxu3 %v1477_v13 }
 0x106   : > { %797 = vmatpush.msrb.mxu3 %v1490_v18 }
 0x108   : > { %799 = vmatpush.msrb.mxu3 %v494_v29 }
 0x13d   : > { %v348_v42 = vpop.f32.mrf.mxu1 }
 0x145   : > { %v322_v43 = vpop.f32.mrf.mxu0  ;;  %v396_v44 = vpop.f32.mrf.mxu1 }
 0x146   : > { %v349_v49 = vadd.f32 %v348_v42, %v322_v43 }
 0x14d   : > { %v372_v48 = vpop.f32.mrf.mxu0  ;;  %v442_v55 = vpop.f32.mrf.mxu1 }
 0x14e   : > { %v373_v50 = vadd.f32 %v372_v48, %v349_v49 }
 0x150   : > { %v397_v52 = vadd.f32 %v396_v44, %v373_v50 }
 0x155   : > { %v420_v53 = vpop.f32.mrf.mxu0 }
 0x156   : > { %v421_v54 = vadd.f32 %v420_v53, %v397_v52 }
 0x158   : > { %v443_v56 = vadd.f32 %v442_v55, %v421_v54 }
 0x15a   : > { %v445_v57 = vsub.f32 %v1311_v0, %v443_v56 }
 0x15c   : > { %v446_v59 = vmul.f32 1.442695, %v445_v57 }
 0x15e   : > { %1011 = vpow2.f32 %v446_v59 }
 0x164   : > { %v1012_v60 = vpop.eup %1011 }
 0x165   : > { %v496_v61 = vand.u32 4294901760, %v1012_v60 }
 0x167   : > { %602 = vmatmul.f32.vlgmr.msra.gmra.mxu3 %v496_v61  ;;  %v497_v63 = vsub.f32 %v1012_v60, %v496_v61 }
 0x169   : > { %656 = vmatmul.f32.vlgmr.msrb.gmra.mxu0 %v497_v63  ;;  %v498_v4 = vand.u32 4294901760, %v497_v63 }
 0x16b   : > { %695 = vmatmul.f32.vlgmr.msrb.gmra.mxu1 %v498_v4  ;;  %v499_v9 = vsub.f32 %v497_v63, %v498_v4 }
 0x16d   : > { %v500_v12 = vand.u32 4294901760, %v499_v9 }
 0x16f   : > { %501 = vmatmul.f32.vlgmr.msra.gmra.mxu2 %v500_v12  ;;  %801 = vmatmul.f32.vlgmr.msrb.gmra.mxu3 %v496_v61 }
 0x177   : > { %764 = vmatmul.f32.vlgmr.msrb.gmra.mxu2 %v496_v61 }
 0x1e6   : > { %v657_v26 = vpop.f32.mrf.mxu0 }
 0x1e8   : > { %v696_v27 = vpop.f32.mrf.mxu1 }
 0x1ea   : > { %v603_v22 = vpop.f32.mrf.mxu3 }
 0x1f2   : > { %v502_v23 = vpop.f32.mrf.mxu2  ;;  %v802_v36 = vpop.f32.mrf.mxu3 }
 0x1f3   : > { %v604_v25 = vadd.f32 %v603_v22, %v502_v23 }
 0x1f5   : > { %v658_v0 = vadd.f32 %v657_v26, %v604_v25 }
 0x1f7   : > { %v697_v30 = vadd.f32 %v696_v27, %v658_v0 }
 0x1fa   : > { %v765_v31 = vpop.f32.mrf.mxu2 }
 0x1fb   : > { %v766_v32 = vadd.f32 %v765_v31, %v697_v30 }
 0x1fd   : > { %v803_v37 = vadd.f32 %v802_v36, %v766_v32 }
 0x1ff   : > { %1013 = vrcp.f32 %v803_v37  ;;  %v816_v47 = vand.u32 2147483648, %v803_v37  ;;  %v814_v2 = vand.u32 2147483647, %v803_v37  ;;  %vm810_vm2 = vweird.f32 %v803_v37 }
 0x201   : > { %v817_v6 = vor.u32 1.1754944e-38, %v816_v47  ;;  %vm815_vm4 = vcmp.eq.f32.partialorder %v814_v2, 8.507059e+37 }
 0x205   : > { %v1014_v38 = vpop.eup %1013 }
 0x206   : > { %v806_v45 = vmul.f32 %v1014_v38, %v803_v37  ;;  %vm811_vm1 = vweird.f32 %v1014_v38 }
 0x207   : > { %vm812_vm3 = vmor %vm810_vm2, %vm811_vm1 }
 0x208   : > { %v807_v46 = vsub.f32 1.0, %v806_v45 }
 0x20a   : > { %v808_v1 = vmul.f32 %v1014_v38, %v807_v46 }
 0x20c   : > { %v809_v3 = vadd.f32 %v1014_v38, %v808_v1 }
 0x20e   : > { %v813_v7 = vsel %vm812_vm3, %v1014_v38, %v809_v3 }
 0x20f   : > { %v818_v8 = vsel %vm815_vm4, %v817_v6, %v813_v7 }
 0x210   : > { %v819_v13 = vmul.f32 %v1012_v60, %v818_v8 }
 0x212   : > { %820 = vst [vmem:[%s218_s27] sm:$0xff] %v819_v13 }
 0x213   : > { %1132 = shalt.err (!%p1129_p11)
}
 0x214   : > { %952 = dma.vmem_to_hbm [thread:$0]  (%p1270_p5), %s835_s28, 128, %s837_s29, %s822_s16  }
 0x215 PF: > { %s848_s11 = sand.u32 1, %s1163_s12   ;;  %p1584_p12 = scmp.ge.s32.totalorder %s1175_s15, 2 }
 0x216   : > { %s849_s21 = scalar_lea.sflag [#allocation4], %s848_s11 }
 0x217   : > { %p966_p13 = pnand %p1584_p12, %p1236_p6 }
 0x219   : > { %p967_p0 = pneg %p966_p13 }
 0x21b   : > { %1158 = dma.done.wait (%p967_p0), %s849_s21, 128  }
 0x21c   : > { %1160 = vsyncadd (%p967_p0), %s849_s21, 4294967168  ;;  %p17_p3 = scmp.ge.s32.totalorder %s1257_s6, 4   ;;  %s1585_s12 = smov %s1167_s13 }
 0x21d   : > { %s1586_s13 = smov %s1171_s14  ;;  %s1587_s14 = smov %s1266_s9 }
 0x21e   : > { %s1588_s15 = smov %s1257_s6  ;;  %19 = sbr.rel (!%p17_p3) target bundleno = 6 (0x6), region = 85 }
 0x223   :  { %855 = vsyncpa [#allocation3], 1 }
 0x224   :  { %857 = vsyncpa [#allocation3 + $0x1], 1 }
 0x225   :  { %858 = vsyncpa [#allocation6], 1 }
 0x226   :  { %859 = vsyncpa [#allocation4], 1 }
 0x227   :  { %861 = vsyncpa [#allocation4 + $0x1], 1 }

</bundles_post_ra>
